<compile_context>
chip_gen: v7x
topology: tpu7x:2x2x1
jax: 0.10.0
libtpu: 0.0.40
codegen_flags: <defaults>
</compile_context>

<pallas_src>
import functools

import jax
import jax.numpy as jnp
from jax.experimental import pallas as pl
from jax.experimental.pallas import tpu as pltpu


# --------------------------------------------------------------------------- #
# Kernel
# --------------------------------------------------------------------------- #
def _actor_softmax_kernel(x_ref, w1_ref, wmid_ref, wout_ref, b_ref, out_ref,
                          *, hidden_dim, out_pad, acts_dtype):
    # Bias stack layout (8, W) f32:
    #   rows 0..3 -> biases of the four ReLU Linears (zero padded to W lanes)
    #   row  4    -> bias of the Tanh Linear
    #   row  5    -> output bias, lanes [out_dim:out_pad] filled with -1e30
    #   rows 6..7 -> sublane padding (unused)
    b = b_ref[...]                                  # (8, W) f32

    def relu_layer(acc, row):
        # bias-add + ReLU in f32 (v5e-safe), then immediately downcast so only a
        # bf16 activation stays live between layers.
        return jnp.maximum(acc + b[row:row + 1, :hidden_dim], 0.0).astype(acts_dtype)

    x = x_ref[...]                                  # already bf16 from the wrapper

    # Layer 1: (bt, in) @ (in, H) + b0, ReLU
    h = relu_layer(jnp.dot(x, w1_ref[...], preferred_element_type=jnp.float32), 0)

    # Layers 2..4: (bt, H) @ (H, H) + b, ReLU   (weights stacked in wmid_ref[0..2])
    for l in range(3):
        h = relu_layer(
            jnp.dot(h, wmid_ref[l], preferred_element_type=jnp.float32), l + 1)

    # Layer 5: Linear + Tanh   (wmid_ref[3])
    h = jnp.tanh(
        jnp.dot(h, wmid_ref[3], preferred_element_type=jnp.float32)
        + b[4:5, :hidden_dim]).astype(acts_dtype)

    # postprocess Linear -> lane-dense (bt, out_pad) logits
    logits = (jnp.dot(h, wout_ref[...], preferred_element_type=jnp.float32)
              + b[5:6, :out_pad])

    # Numerically-stable softmax over the padded last dim (padded lanes -> exp == 0).
    m = jnp.max(logits, axis=-1, keepdims=True)
    e = jnp.exp(logits - m)
    denom = jnp.sum(e, axis=-1, keepdims=True)
    out_ref[...] = (e / denom).astype(out_ref.dtype)   # exact row normalization


# --------------------------------------------------------------------------- #
# One-time parameter packing (run once per parameter update, NOT per forward)
# --------------------------------------------------------------------------- #
def prepare_params(params, matmul_dtype=jnp.bfloat16):
    """params: 6 x (W, b) with W shaped (in_features, out_features), b (1, out)."""
    hidden = params[0][0].shape[1]
    out_dim = params[5][0].shape[1]
    out_pad = ((out_dim + 127) // 128) * 128
    W = max(hidden, out_pad)

    w1 = params[0][0].astype(matmul_dtype)                               # (in, H)
    w_mid = jnp.stack([params[i][0] for i in range(1, 5)], 0).astype(matmul_dtype)  # (4,H,H)
    w_out = (jnp.zeros((hidden, out_pad), matmul_dtype)
             .at[:, :out_dim].set(params[5][0].astype(matmul_dtype)))    # (H, out_pad)

    rows = []
    for i in range(5):
        rows.append(jnp.zeros((W,), jnp.float32)
                    .at[:hidden].set(params[i][1].reshape(-1).astype(jnp.float32)))
    rows.append(jnp.full((W,), -1e30, jnp.float32)
                .at[:out_dim].set(params[5][1].reshape(-1).astype(jnp.float32)))
    rows += [jnp.zeros((W,), jnp.float32)] * 2                           # pad to 8 sublanes
    b_stack = jnp.stack(rows, axis=0)                                    # (8, W)

    return {"w1": w1, "w_mid": w_mid, "w_out": w_out, "b_stack": b_stack,
            "out_dim": int(out_dim)}


# --------------------------------------------------------------------------- #
# Tile selection (generation aware)
# --------------------------------------------------------------------------- #
def _num_tensorcores():
    try:
        d = jax.devices()[0]
        n = getattr(d, "num_cores", None)
        if n:
            return int(n)
        kind = str(getattr(d, "device_kind", "")).lower()
        if "v4" in kind or "v5p" in kind or "v7" in kind:
            return 2
    except Exception:
        pass
    return 1


def _pick_batch_tile(B, num_cores, max_tile=1024):
    if num_cores >= 2 and B > 8:
        bt = -(-B // num_cores)                 # cdiv: every core gets a block
        bt = ((bt + 15) // 16) * 16             # bf16-friendly sublane multiple
        return min(bt, max_tile, B)
    # Single TensorCore: one big tile beats pipelining for this tiny working set.
    return min(B, max_tile)


# --------------------------------------------------------------------------- #
# Forward
# --------------------------------------------------------------------------- #
@functools.partial(jax.jit, static_argnames=("out_dim", "batch_tile"))
def _forward_impl(x, w1, w_mid, w_out, b_stack, *, out_dim, batch_tile):
    B, input_len = x.shape
    hidden = w1.shape[1]
    out_pad = w_out.shape[1]
    mxu_dtype = w1.dtype

    x = x.astype(mxu_dtype)                      # cast once; halves kernel x DMA bytes

    bt = batch_tile
    grid = (pl.cdiv(B, bt),)

    kernel = functools.partial(_actor_softmax_kernel,
                               hidden_dim=hidden, out_pad=out_pad,
                               acts_dtype=mxu_dtype)

    probs_padded = pl.pallas_call(
        kernel,
        out_shape=jax.ShapeDtypeStruct((B, out_pad), jnp.float32),
        grid_spec=pltpu.PrefetchScalarGridSpec(
            num_scalar_prefetch=0,
            grid=grid,
            in_specs=[
                pl.BlockSpec((bt, input_len), lambda i: (i, 0)),
                # Constant index_maps: Pallas fetches these once and keeps them
                # resident across grid steps.
                pl.BlockSpec(w1.shape, lambda i: (0, 0)),
                pl.BlockSpec(w_mid.shape, lambda i: (0, 0, 0)),
                pl.BlockSpec(w_out.shape, lambda i: (0, 0)),
                pl.BlockSpec(b_stack.shape, lambda i: (0, 0)),
            ],
            out_specs=pl.BlockSpec((bt, out_pad), lambda i: (i, 0)),
        ),
        compiler_params=pltpu.CompilerParams(
            dimension_semantics=("parallel",),
        ),
    )(x, w1, w_mid, w_out, b_stack)

    # Slice back to the module's true output width.  Consumers that can index
    # the padded block themselves may call _forward_impl directly and skip this.
    return probs_padded[:, :out_dim]


def actor_softmax_forward(x, packed, *, batch_tile=None):
    """x: (B, input_len) float32.  packed: output of prepare_params()."""
    if batch_tile is None:
        batch_tile = _pick_batch_tile(int(x.shape[0]), _num_tensorcores())
    return _forward_impl(x, packed["w1"], packed["w_mid"], packed["w_out"],
                         packed["b_stack"],
                         out_dim=packed["out_dim"], batch_tile=batch_tile)


# --------------------------------------------------------------------------- #
# Reference / init helpers
# --------------------------------------------------------------------------- #
def init_params(key, input_len, output_dim, hidden_dim):
    """PyTorch Linear default init: U[-1/sqrt(fan_in), 1/sqrt(fan_in)]."""
    dims = ([(input_len, hidden_dim)] + [(hidden_dim, hidden_dim)] * 4
            + [(hidden_dim, output_dim)])
    params = []
    for (fan_in, fan_out) in dims:
        key, kw, kb = jax.random.split(key, 3)
        bound = 1.0 / jnp.sqrt(jnp.float32(fan_in))
        w = jax.random.uniform(kw, (fan_in, fan_out), jnp.float32, -bound, bound)
        b = jax.random.uniform(kb, (1, fan_out), jnp.float32, -bound, bound)
        params.append((w, b))
    return params


def reference_forward(x, params):
    h = x
    for i, (w, b) in enumerate(params):
        h = h @ w + b
        if i < 4:
            h = jnp.maximum(h, 0.0)
        elif i == 4:
            h = jnp.tanh(h)
    return jax.nn.softmax(h, axis=-1)


# --------------------------------------------------------------------------- #
if __name__ == "__main__":
    key = jax.random.PRNGKey(0)
    batch = 64
    input_len = 16
    hidden_dim = 128
    output_dim = 6

    key, kx, kp = jax.random.split(key, 3)
    x = jax.random.normal(kx, (batch, input_len), jnp.float32)
    params = init_params(kp, input_len, output_dim, hidden_dim)

    packed = prepare_params(params)                 # one-time packing
    probs = actor_softmax_forward(x, packed)
    probs = jax.block_until_ready(probs)

    ref = reference_forward(x, params)
    assert probs.shape == (batch, output_dim)
    # Exact reciprocal -> rows sum to 1 within f32 rounding.
    assert jnp.allclose(jnp.sum(probs, axis=-1), 1.0, atol=1e-3)
    # bf16 MXU inputs/activations -> ~2e-2 agreement with the f32 reference.
    assert jnp.allclose(probs, ref, atol=2e-2, rtol=2e-2)

    print("KERNEL_OK")
</pallas_src>

<mosaic_0001>
module attributes {stable_mosaic.version = 11 : i64} {
  func.func @_actor_softmax_kernel(%arg0: i32, %arg1: memref<64x16xbf16, #tpu.memory_space<vmem>>, %arg2: memref<16x128xbf16, #tpu.memory_space<vmem>>, %arg3: memref<4x128x128xbf16, #tpu.memory_space<vmem>>, %arg4: memref<128x128xbf16, #tpu.memory_space<vmem>>, %arg5: memref<8x128xf32, #tpu.memory_space<vmem>>, %arg6: memref<64x128xf32, #tpu.memory_space<vmem>>) attributes {dimension_semantics = [#tpu.dimension_semantics<parallel>], iteration_bounds = array<i64: 1>, scalar_prefetch = 0 : i64, scratch_operands = 0 : i64, tpu.core_type = #tpu.core_type<tc>, window_params = [{transform_indices = @transform_0, window_bounds = array<i64: 64, 16>}, {pipeline_mode = #tpu.pipeline_mode<synchronous>, transform_indices = @transform_1, window_bounds = array<i64: 16, 128>}, {pipeline_mode = #tpu.pipeline_mode<synchronous>, transform_indices = @transform_2, window_bounds = array<i64: 4, 128, 128>}, {pipeline_mode = #tpu.pipeline_mode<synchronous>, transform_indices = @transform_3, window_bounds = array<i64: 128, 128>}, {pipeline_mode = #tpu.pipeline_mode<synchronous>, transform_indices = @transform_4, window_bounds = array<i64: 8, 128>}, {transform_indices = @transform_5, window_bounds = array<i64: 64, 128>}]} {
    %c0 = arith.constant 0 : index
    %c0_0 = arith.constant 0 : index
    %0 = vector.load %arg5[%c0, %c0_0] : memref<8x128xf32, #tpu.memory_space<vmem>>, vector<8x128xf32>
    %c0_1 = arith.constant 0 : index
    %c0_2 = arith.constant 0 : index
    %1 = vector.load %arg1[%c0_1, %c0_2] : memref<64x16xbf16, #tpu.memory_space<vmem>>, vector<64x16xbf16>
    %c0_3 = arith.constant 0 : index
    %c0_4 = arith.constant 0 : index
    %2 = vector.load %arg2[%c0_3, %c0_4] : memref<16x128xbf16, #tpu.memory_space<vmem>>, vector<16x128xbf16>
    %cst = arith.constant dense<0.000000e+00> : vector<64x128xf32>
    %3 = tpu.matmul %1, %2, %cst {dimension_numbers = #tpu.dot_dimension_numbers<[1], [0], [0], [1], [0, 0, 1, 1], [], []>} : vector<64x16xbf16>, vector<16x128xbf16>, vector<64x128xf32> -> vector<64x128xf32>
    %4 = vector.extract_strided_slice %0 {offsets = [0, 0], sizes = [1, 128], strides = [1, 1]} : vector<8x128xf32> to vector<1x128xf32>
    %5 = vector.broadcast %4 : vector<1x128xf32> to vector<64x128xf32>
    %6 = arith.addf %3, %5 : vector<64x128xf32>
    %cst_5 = arith.constant 0.000000e+00 : f32
    %7 = vector.broadcast %cst_5 : f32 to vector<64x128xf32>
    %8 = arith.maximumf %6, %7 : vector<64x128xf32>
    %9 = arith.truncf %8 : vector<64x128xf32> to vector<64x128xbf16>
    %c0_6 = arith.constant 0 : index
    %c0_7 = arith.constant 0 : index
    %c0_8 = arith.constant 0 : index
    %10 = vector.load %arg3[%c0_6, %c0_7, %c0_8] : memref<4x128x128xbf16, #tpu.memory_space<vmem>>, vector<1x128x128xbf16>
    %11 = vector.shape_cast %10 : vector<1x128x128xbf16> to vector<128x128xbf16>
    %cst_9 = arith.constant dense<0.000000e+00> : vector<64x128xf32>
    %12 = tpu.matmul %9, %11, %cst_9 {dimension_numbers = #tpu.dot_dimension_numbers<[1], [0], [0], [1], [0, 0, 1, 1], [], []>} : vector<64x128xbf16>, vector<128x128xbf16>, vector<64x128xf32> -> vector<64x128xf32>
    %13 = vector.extract_strided_slice %0 {offsets = [1, 0], sizes = [1, 128], strides = [1, 1]} : vector<8x128xf32> to vector<1x128xf32>
    %14 = vector.broadcast %13 : vector<1x128xf32> to vector<64x128xf32>
    %15 = arith.addf %12, %14 : vector<64x128xf32>
    %cst_10 = arith.constant 0.000000e+00 : f32
    %16 = vector.broadcast %cst_10 : f32 to vector<64x128xf32>
    %17 = arith.maximumf %15, %16 : vector<64x128xf32>
    %18 = arith.truncf %17 : vector<64x128xf32> to vector<64x128xbf16>
    %c1 = arith.constant 1 : index
    %c0_11 = arith.constant 0 : index
    %c0_12 = arith.constant 0 : index
    %19 = vector.load %arg3[%c1, %c0_11, %c0_12] : memref<4x128x128xbf16, #tpu.memory_space<vmem>>, vector<1x128x128xbf16>
    %20 = vector.shape_cast %19 : vector<1x128x128xbf16> to vector<128x128xbf16>
    %cst_13 = arith.constant dense<0.000000e+00> : vector<64x128xf32>
    %21 = tpu.matmul %18, %20, %cst_13 {dimension_numbers = #tpu.dot_dimension_numbers<[1], [0], [0], [1], [0, 0, 1, 1], [], []>} : vector<64x128xbf16>, vector<128x128xbf16>, vector<64x128xf32> -> vector<64x128xf32>
    %22 = vector.extract_strided_slice %0 {offsets = [2, 0], sizes = [1, 128], strides = [1, 1]} : vector<8x128xf32> to vector<1x128xf32>
    %23 = vector.broadcast %22 : vector<1x128xf32> to vector<64x128xf32>
    %24 = arith.addf %21, %23 : vector<64x128xf32>
    %cst_14 = arith.constant 0.000000e+00 : f32
    %25 = vector.broadcast %cst_14 : f32 to vector<64x128xf32>
    %26 = arith.maximumf %24, %25 : vector<64x128xf32>
    %27 = arith.truncf %26 : vector<64x128xf32> to vector<64x128xbf16>
    %c2 = arith.constant 2 : index
    %c0_15 = arith.constant 0 : index
    %c0_16 = arith.constant 0 : index
    %28 = vector.load %arg3[%c2, %c0_15, %c0_16] : memref<4x128x128xbf16, #tpu.memory_space<vmem>>, vector<1x128x128xbf16>
    %29 = vector.shape_cast %28 : vector<1x128x128xbf16> to vector<128x128xbf16>
    %cst_17 = arith.constant dense<0.000000e+00> : vector<64x128xf32>
    %30 = tpu.matmul %27, %29, %cst_17 {dimension_numbers = #tpu.dot_dimension_numbers<[1], [0], [0], [1], [0, 0, 1, 1], [], []>} : vector<64x128xbf16>, vector<128x128xbf16>, vector<64x128xf32> -> vector<64x128xf32>
    %31 = vector.extract_strided_slice %0 {offsets = [3, 0], sizes = [1, 128], strides = [1, 1]} : vector<8x128xf32> to vector<1x128xf32>
    %32 = vector.broadcast %31 : vector<1x128xf32> to vector<64x128xf32>
    %33 = arith.addf %30, %32 : vector<64x128xf32>
    %cst_18 = arith.constant 0.000000e+00 : f32
    %34 = vector.broadcast %cst_18 : f32 to vector<64x128xf32>
    %35 = arith.maximumf %33, %34 : vector<64x128xf32>
    %36 = arith.truncf %35 : vector<64x128xf32> to vector<64x128xbf16>
    %c3 = arith.constant 3 : index
    %c0_19 = arith.constant 0 : index
    %c0_20 = arith.constant 0 : index
    %37 = vector.load %arg3[%c3, %c0_19, %c0_20] : memref<4x128x128xbf16, #tpu.memory_space<vmem>>, vector<1x128x128xbf16>
    %38 = vector.shape_cast %37 : vector<1x128x128xbf16> to vector<128x128xbf16>
    %cst_21 = arith.constant dense<0.000000e+00> : vector<64x128xf32>
    %39 = tpu.matmul %36, %38, %cst_21 {dimension_numbers = #tpu.dot_dimension_numbers<[1], [0], [0], [1], [0, 0, 1, 1], [], []>} : vector<64x128xbf16>, vector<128x128xbf16>, vector<64x128xf32> -> vector<64x128xf32>
    %40 = vector.extract_strided_slice %0 {offsets = [4, 0], sizes = [1, 128], strides = [1, 1]} : vector<8x128xf32> to vector<1x128xf32>
    %41 = vector.broadcast %40 : vector<1x128xf32> to vector<64x128xf32>
    %42 = arith.addf %39, %41 : vector<64x128xf32>
    %43 = math.tanh %42 : vector<64x128xf32>
    %44 = arith.truncf %43 : vector<64x128xf32> to vector<64x128xbf16>
    %c0_22 = arith.constant 0 : index
    %c0_23 = arith.constant 0 : index
    %45 = vector.load %arg4[%c0_22, %c0_23] : memref<128x128xbf16, #tpu.memory_space<vmem>>, vector<128x128xbf16>
    %cst_24 = arith.constant dense<0.000000e+00> : vector<64x128xf32>
    %46 = tpu.matmul %44, %45, %cst_24 {dimension_numbers = #tpu.dot_dimension_numbers<[1], [0], [0], [1], [0, 0, 1, 1], [], []>} : vector<64x128xbf16>, vector<128x128xbf16>, vector<64x128xf32> -> vector<64x128xf32>
    %47 = vector.extract_strided_slice %0 {offsets = [5, 0], sizes = [1, 128], strides = [1, 1]} : vector<8x128xf32> to vector<1x128xf32>
    %48 = vector.broadcast %47 : vector<1x128xf32> to vector<64x128xf32>
    %49 = arith.addf %46, %48 : vector<64x128xf32>
    %cst_25 = arith.constant dense<0xFF800000> : vector<64xf32>
    %50 = vector.multi_reduction <maximumf>, %49, %cst_25 [1] : vector<64x128xf32> to vector<64xf32>
    %51 = vector.shape_cast %50 : vector<64xf32> to vector<64x1xf32>
    %52 = vector.broadcast %51 : vector<64x1xf32> to vector<64x128xf32>
    %53 = arith.subf %49, %52 : vector<64x128xf32>
    %54 = math.exp %53 : vector<64x128xf32>
    %cst_26 = arith.constant dense<0.000000e+00> : vector<64xf32>
    %55 = vector.multi_reduction <add>, %54, %cst_26 [1] : vector<64x128xf32> to vector<64xf32>
    %56 = vector.shape_cast %55 : vector<64xf32> to vector<64x1xf32>
    %57 = vector.broadcast %56 : vector<64x1xf32> to vector<64x128xf32>
    %58 = arith.divf %54, %57 : vector<64x128xf32>
    %c0_27 = arith.constant 0 : index
    %c0_28 = arith.constant 0 : index
    %59 = vector.load %arg6[%c0_27, %c0_28] : memref<64x128xf32, #tpu.memory_space<vmem>>, vector<64x128xf32>
    tpu.vector_store %arg6[%c0_27, %c0_28], %58 {strides = array<i32>} : memref<64x128xf32, #tpu.memory_space<vmem>>, vector<64x128xf32>,
    return
  }
  func.func @transform_0(%arg0: i32) -> (i32, i32) {
    %c0_i32 = arith.constant 0 : i32
    %c0_i32_0 = arith.constant 0 : i32
    return %arg0, %c0_i32 : i32, i32
  }
  func.func @transform_1(%arg0: i32) -> (i32, i32) {
    %c0_i32 = arith.constant 0 : i32
    %c0_i32_0 = arith.constant 0 : i32
    %c0_i32_1 = arith.constant 0 : i32
    return %c0_i32, %c0_i32_0 : i32, i32
  }
  func.func @transform_2(%arg0: i32) -> (i32, i32, i32) {
    %c0_i32 = arith.constant 0 : i32
    %c0_i32_0 = arith.constant 0 : i32
    %c0_i32_1 = arith.constant 0 : i32
    %c0_i32_2 = arith.constant 0 : i32
    return %c0_i32, %c0_i32_0, %c0_i32_1 : i32, i32, i32
  }
  func.func @transform_3(%arg0: i32) -> (i32, i32) {
    %c0_i32 = arith.constant 0 : i32
    %c0_i32_0 = arith.constant 0 : i32
    %c0_i32_1 = arith.constant 0 : i32
    return %c0_i32, %c0_i32_0 : i32, i32
  }
  func.func @transform_4(%arg0: i32) -> (i32, i32) {
    %c0_i32 = arith.constant 0 : i32
    %c0_i32_0 = arith.constant 0 : i32
    %c0_i32_1 = arith.constant 0 : i32
    return %c0_i32, %c0_i32_0 : i32, i32
  }
  func.func @transform_5(%arg0: i32) -> (i32, i32) {
    %c0_i32 = arith.constant 0 : i32
    %c0_i32_0 = arith.constant 0 : i32
    return %arg0, %c0_i32 : i32, i32
  }
}

</mosaic_0001>

<bundles_post_ra>
// kernel: _forward_impl.1
= control target key start
LH: loop header
LB: loop body
LE: loop exit
PB: predicated region body
PF: predicated region fallthrough
CT: control target
= control target key end

     0   :  { %10 = vsyncpa [#allocation3], 0  ;;  %s1526_s0 = inlined_call_operand.vmem [shape: bf16[64,16], index: 0, kind: input, shape index: {}]   ;;  %s1527_s1 = inlined_call_operand.vmem [shape: bf16[16,128], index: 1, kind: input, shape index: {}]   ;;  %s1528_s2 = inlined_call_operand.hbm [shape: bf16[4,128,128], index: 2, kind: input, shape index: {}]   ;;  %s1529_s3 = inlined_call_operand.vmem [shape: bf16[128,128], index: 3, kind: input, shape index: {}]   ;;  %s1530_s4 = inlined_call_operand.hbm [shape: f32[8,128], index: 4, kind: input, shape index: {}]   ;;  %s1531_s5 = inlined_call_operand.vmem [shape: f32[64,128], index: 5, kind: output, shape index: {}]  }
   0x1   :  { %11 = vsyncpa [#allocation5], 0  ;;  %s1385_s18 = smov [#allocation2]   ;;  %s1337_s22 = scalar_lea.hbm %s1528_s2, 4096 }
   0x2   :  { %s21_s19 = sshll.u32 %s1385_s18, 4  ;;  %p1338_p0 = scmp.ne.s32.totalorder %s1528_s2, %s1337_s22  ;;  %s22_s19 = int_to_ptr.vmem [resolvable:$true] %s21_s19 }
   0x3   :  { %p1341_p1 = scmp.lt.u32.totalorder %s1337_s22, %s1528_s2 }
   0x5   :  { %p1343_p2 = pnand %p1341_p1, %p1338_p0 }
   0x7   :  { %1346 = shalt.err (!%p1343_p2)
}
   0x8   :  { %s1347_s27 = scalar_lea.vmem %s22_s19, 4096  ;;  %p1352_p4 = scmp.lt.s32.totalorder %s22_s19, %s22_s19 }
   0x9   :  { %p1348_p3 = scmp.ne.s32.totalorder %s22_s19, %s1347_s27  ;;  %p1353_p5 = scmp.lt.s32.totalorder %s1347_s27, %s1347_s27 }
   0xb   :  { %p1354_p6 = por %p1353_p5, %p1352_p4 }
   0xd   :  { %p1355_p7 = pnand %p1354_p6, %p1348_p3 }
   0xf   :  { %1358 = shalt.err (!%p1355_p7)
}
  0x10   :  { %s1386_s28 = smov 64   ;;  %s1387_s29 = smov 4  }
  0x11   :  { %27 = dma.hbm_to_vmem [thread:$0]  %s1528_s2, 4096, %s22_s19, [#allocation3], %s1386_s28, %s1386_s28, %s1387_s29  }
  0x12   :  { %s1388_s7 = smov [#allocation4]   ;;  %s1359_s11 = scalar_lea.hbm %s1530_s4, 128 }
  0x13   :  { %s36_s8 = sshll.u32 %s1388_s7, 4  ;;  %p1360_p8 = scmp.ne.s32.totalorder %s1530_s4, %s1359_s11  ;;  %s37_s8 = int_to_ptr.vmem [resolvable:$true] %s36_s8 }
  0x14   :  { %p1363_p9 = scmp.lt.u32.totalorder %s1359_s11, %s1530_s4 }
  0x16   :  { %p1365_p10 = pnand %p1363_p9, %p1360_p8 }
  0x18   :  { %1368 = shalt.err (!%p1365_p10)
}
  0x19   :  { %s1369_s16 = scalar_lea.vmem %s37_s8, 128  ;;  %p1374_p12 = scmp.lt.s32.totalorder %s37_s8, %s37_s8 }
  0x1a   :  { %p1370_p11 = scmp.ne.s32.totalorder %s37_s8, %s1369_s16  ;;  %p1375_p13 = scmp.lt.s32.totalorder %s1369_s16, %s1369_s16 }
  0x1c   :  { %p1376_p0 = por %p1375_p13, %p1374_p12 }
  0x1e   :  { %p1377_p1 = pnand %p1376_p0, %p1370_p11 }
  0x20   :  { %1380 = shalt.err (!%p1377_p1)
}
  0x21   :  { %39 = dma.hbm_to_vmem [thread:$0]  %s1530_s4, 128, %s37_s8, [#allocation5]  }
  0x22   :  { %1381 = dma.done.wait [#allocation3], 4096  }
  0x23   :  { %1382 = vsyncadd [#allocation3], 4294963200 }
  0x24   :  { %1383 = dma.done.wait [#allocation5], 128  }
  0x25   :  { %1384 = vsyncadd [#allocation5], 4294967168  ;;  %v1244_v0 = vld [vmem:[%s1527_s1] sm:$0xff]   ;;  %vm88_vm0 = vcmask 130048   ;;  %v1246_v2 = vld [vmem:[%s1526_s0 + $0x8] sm:$0xff]   ;;  %v58_v19 = vlaneseq }
  0x26   :  { %v1245_v1 = vld [vmem:[%s1526_s0] sm:$0xff]   ;;  %1094 = vmatprep.subr.bf16.mxu0 %v1244_v0  ;;  %v1247_v3 = vld [vmem:[%s1526_s0 + $0x10] sm:$0xff]   ;;  %v1250_v5 = vld [vmem:[#allocation2 + $0x8] sm:$0xff]  }
  0x27   :  { %1095 = vmatpush3.bf16.msra.mxu0 %v1244_v0  ;;  %1096 = vmatprep.mubr.msk.bf16.mxu0 %vm88_vm0, %v1245_v1  ;;  %v1249_v4 = vld [vmem:[#allocation2] sm:$0xff]   ;;  %v1251_v6 = vld [vmem:[#allocation2 + $0x10] sm:$0xff]   ;;  %v1248_v7 = vld [vmem:[%s1526_s0 + $0x18] sm:$0xff]   ;;  %v1462_v20 = vshrl.u32 %v58_v19, 7 }
  0x28   :  { %1104 = vmatprep.subr.bf16.mxu1 %v1249_v4  ;;  %v1252_v8 = vld [vmem:[#allocation2 + $0x18] sm:$0xff]   ;;  %v1253_v9 = vld [vmem:[#allocation2 + $0x20] sm:$0xff]   ;;  %v1254_v10 = vld [vmem:[#allocation2 + $0x28] sm:$0xff]  }
  0x29   :  { %1105 = vmatpush3.bf16.msra.mxu1 %v1249_v4  ;;  %v1255_v11 = vld [vmem:[#allocation2 + $0x30] sm:$0xff]   ;;  %v1256_v12 = vld [vmem:[#allocation2 + $0x38] sm:$0xff]   ;;  %v1257_v13 = vld [vmem:[#allocation2 + $0x40] sm:$0xff]   ;;  %v60_v21 = vsub.s32 0, %v1462_v20  ;;  %v196_v60 = vsub.s32 1, %v1462_v20 }
  0x2a   :  { %1097 = vmatmul.mubr.msk.bf16.vlgmr.msra.gmra.mrb[0].mxu0 %vm88_vm0, %v1246_v2  ;;  %1106 = vmatprep.subr.bf16.mxu1 %v1250_v5  ;;  %v1258_v14 = vld [vmem:[#allocation2 + $0x48] sm:$0xff]   ;;  %v1259_v15 = vld [vmem:[#allocation2 + $0x50] sm:$0xff]   ;;  %v1260_v16 = vld [vmem:[#allocation2 + $0x58] sm:$0xff]  }
  0x2b   :  { %1100 = vmatprep.mubr.msk.bf16.mxu0 %vm88_vm0, %v1247_v3  ;;  %1128 = vmatprep.subr.bf16.mxu0 %v1257_v13  ;;  %v1261_v17 = vld [vmem:[#allocation2 + $0x60] sm:$0xff]   ;;  %v1262_v18 = vld [vmem:[#allocation2 + $0x68] sm:$0xff]   ;;  %v1263_v52 = vld [vmem:[#allocation2 + $0x70] sm:$0xff]  }
  0x2c   :  { %1129 = vmatpush3.bf16.msra.mxu0 %v1257_v13  ;;  %v1465_v22 = vld [vmem:[#allocation4] sm:$0xff]  ;;  %v1264_v53 = vld [vmem:[#allocation2 + $0x78] sm:$0xff]   ;;  %v1266_v55 = vld [vmem:[#allocation2 + $0x88] sm:$0xff]  }
  0x2d   :  { %1107 = vmatpush3.bf16.msra.mxu1 %v1250_v5  ;;  %1130 = vmatprep.subr.bf16.mxu0 %v1258_v14  ;;  %v61_v23 = vrot.slane %v1465_v22, %v60_v21  ;;  %v1265_v54 = vld [vmem:[#allocation2 + $0x80] sm:$0xff]   ;;  %v1267_v56 = vld [vmem:[#allocation2 + $0x90] sm:$0xff]   ;;  %v1268_v57 = vld [vmem:[#allocation2 + $0x98] sm:$0xff]   ;;  %v197_v61 = vrot.slane %v1465_v22, %v196_v60 }
  0x2e   :  { %1108 = vmatprep.subr.bf16.mxu1 %v1251_v6  ;;  %v1269_v58 = vld [vmem:[#allocation2 + $0xa0] sm:$0xff]   ;;  %v1270_v59 = vld [vmem:[#allocation2 + $0xa8] sm:$0xff]  }
  0x30   :  { %1131 = vmatpush3.bf16.msra.mxu0 %v1258_v14 }
  0x31   :  { %1109 = vmatpush3.bf16.msra.mxu1 %v1251_v6  ;;  %1132 = vmatprep.subr.bf16.mxu0 %v1259_v15 }
  0x32   :  { %1101 = vmatmul.mubr.msk.bf16.gmra.mrb[4].mxu0 %vm88_vm0, %v1248_v7  ;;  %1110 = vmatprep.subr.bf16.mxu1 %v1252_v8 }
  0x34   :  { %1133 = vmatpush3.bf16.msra.mxu0 %v1259_v15 }
  0x35   :  { %1111 = vmatpush3.bf16.msra.mxu1 %v1252_v8  ;;  %1134 = vmatprep.subr.bf16.mxu0 %v1260_v16 }
  0x36   :  { %1112 = vmatprep.subr.bf16.mxu1 %v1253_v9 }
  0x38   :  { %1135 = vmatpush3.bf16.msra.mxu0 %v1260_v16 }
  0x39   :  { %1113 = vmatpush3.bf16.msra.mxu1 %v1253_v9  ;;  %1136 = vmatprep.subr.bf16.mxu0 %v1261_v17 }
  0x3a   :  { %1114 = vmatprep.subr.bf16.mxu1 %v1254_v10 }
  0x3c   :  { %1137 = vmatpush3.bf16.msra.mxu0 %v1261_v17 }
  0x3d   :  { %1115 = vmatpush3.bf16.msra.mxu1 %v1254_v10  ;;  %1138 = vmatprep.subr.bf16.mxu0 %v1262_v18 }
  0x3e   :  { %1116 = vmatprep.subr.bf16.mxu1 %v1255_v11 }
  0x40   :  { %1139 = vmatpush3.bf16.msra.mxu0 %v1262_v18 }
  0x41   :  { %1117 = vmatpush3.bf16.msra.mxu1 %v1255_v11  ;;  %1140 = vmatprep.subr.bf16.mxu0 %v1263_v52 }
  0x42   :  { %1118 = vmatprep.subr.bf16.mxu1 %v1256_v12 }
  0x44   :  { %1141 = vmatpush3.bf16.msra.mxu0 %v1263_v52 }
  0x45   :  { %1119 = vmatpush3.bf16.msra.mxu1 %v1256_v12  ;;  %1142 = vmatprep.subr.bf16.mxu0 %v1264_v53 }
  0x46   :  { %1152 = vmatprep.subr.bf16.mxu1 %v1265_v54 }
  0x48   :  { %1143 = vmatpush3.bf16.msra.mxu0 %v1264_v53 }
  0xfd   :  { %v1098_v24 = vpop.f32.mrb[0].mxu0 }
  0xfe   :  { %v144_v25 = vadd.f32 %v1098_v24, %v61_v23  ;;  %v135_v26 = vpop.f32.mrb[1].mxu0 }
  0xff   :  { %v136_v27 = vadd.f32 %v135_v26, %v61_v23  ;;  %v1099_v28 = vpop.f32.mrb[2].mxu0 }
 0x100   :  { %v147_v29 = vadd.f32 %v1099_v28, %v61_v23  ;;  %v138_v30 = vpop.f32.mrb[3].mxu0  ;;  %v168_v32 = vmax.f32 %v144_v25, 0.0  ;;  %v1271_v28 = vld [vmem:[#allocation2 + $0xb0] sm:$0xff]  }
 0x101   :  { %v139_v31 = vadd.f32 %v138_v30, %v61_v23  ;;  %v166_v34 = vmax.f32 %v136_v27, 0.0  ;;  %v1273_v30 = vld [vmem:[#allocation2 + $0xc0] sm:$0xff]  }
 0x102   :  { %v169_v33 = vmax.f32 %v147_v29, 0.0  ;;  %v1272_v29 = vld [vmem:[#allocation2 + $0xb8] sm:$0xff]   ;;  %1176 = vmatprep.subr.bf16.mxu0 %v1273_v30 }
 0x103   :  { %v167_v35 = vmax.f32 %v139_v31, 0.0  ;;  %v1274_v31 = vld [vmem:[#allocation2 + $0xc8] sm:$0xff]  }
 0x104   :  { %v175_v36 = vpack.c.bf16 %v169_v33, %v168_v32  ;;  %v1275_v32 = vld [vmem:[#allocation2 + $0xd0] sm:$0xff]   ;;  %v1276_v33 = vld [vmem:[#allocation2 + $0xd8] sm:$0xff]  }
 0x105   :  { %v1102_v37 = vpop.f32.mrb[4].mxu0  ;;  %v174_v38 = vpack.c.bf16 %v167_v35, %v166_v34  ;;  %v1277_v34 = vld [vmem:[#allocation2 + $0xe0] sm:$0xff]   ;;  %v1278_v35 = vld [vmem:[#allocation2 + $0xe8] sm:$0xff]  }
 0x106   :  { %v160_v39 = vadd.f32 %v1102_v37, %v61_v23  ;;  %v151_v40 = vpop.f32.mrb[5].mxu0 }
 0x107   :  { %v152_v41 = vadd.f32 %v151_v40, %v61_v23  ;;  %v1103_v42 = vpop.f32.mrb[6].mxu0  ;;  %1120 = vmatprep.mubr.bf16.mxu1 %v174_v38 }
 0x108   :  { %v172_v43 = vmax.f32 %v160_v39, 0.0  ;;  %v163_v44 = vadd.f32 %v1103_v42, %v61_v23  ;;  %v154_v45 = vpop.f32.mrb[7].mxu0  ;;  %1121 = vmatmul.mubr.bf16.vlgmr.msra.gmra.mrb[0].mxu1 %v175_v36  ;;  %v342_v36 = vsub.s32 2, %v1462_v20 }
 0x109   :  { %v155_v46 = vadd.f32 %v154_v45, %v61_v23  ;;  %v170_v48 = vmax.f32 %v152_v41, 0.0  ;;  %1153 = vmatpush3.bf16.msra.mxu1 %v1265_v54 }
 0x10a   :  { %v173_v47 = vmax.f32 %v163_v44, 0.0  ;;  %1154 = vmatprep.subr.bf16.mxu1 %v1266_v55  ;;  %v343_v37 = vrot.slane %v1465_v22, %v342_v36 }
 0x10b   :  { %v171_v49 = vmax.f32 %v155_v46, 0.0 }
 0x10c   :  { %v177_v50 = vpack.c.bf16 %v173_v47, %v172_v43 }
 0x10d   :  { %v176_v51 = vpack.c.bf16 %v171_v49, %v170_v48  ;;  %1155 = vmatpush3.bf16.msra.mxu1 %v1266_v55 }
 0x10e   :  { %1156 = vmatprep.subr.bf16.mxu1 %v1267_v56 }
 0x10f   :  { %1124 = vmatprep.mubr.bf16.mxu1 %v176_v51 }
 0x110   :  { %1125 = vmatmul.mubr.bf16.gmra.mrb[4].mxu1 %v177_v50 }
 0x111   :  { %1157 = vmatpush3.bf16.msra.mxu1 %v1267_v56 }
 0x112   :  { %1158 = vmatprep.subr.bf16.mxu1 %v1268_v57 }
 0x115   :  { %1159 = vmatpush3.bf16.msra.mxu1 %v1268_v57 }
 0x116   :  { %1160 = vmatprep.subr.bf16.mxu1 %v1269_v58 }
 0x119   :  { %1161 = vmatpush3.bf16.msra.mxu1 %v1269_v58 }
 0x11a   :  { %1162 = vmatprep.subr.bf16.mxu1 %v1270_v59 }
 0x11d   :  { %1163 = vmatpush3.bf16.msra.mxu1 %v1270_v59 }
 0x11e   :  { %1164 = vmatprep.subr.bf16.mxu1 %v1271_v28 }
 0x121   :  { %1165 = vmatpush3.bf16.msra.mxu1 %v1271_v28 }
 0x122   :  { %1166 = vmatprep.subr.bf16.mxu1 %v1272_v29 }
 0x125   :  { %1167 = vmatpush3.bf16.msra.mxu1 %v1272_v29 }
 0x1db   :  { %v1122_v62 = vpop.f32.mrb[0].mxu1 }
 0x1dc   :  { %v289_v63 = vadd.f32 %v1122_v62, %v197_v61  ;;  %v280_v0 = vpop.f32.mrb[1].mxu1 }
 0x1dd   :  { %v281_v1 = vadd.f32 %v280_v0, %v197_v61  ;;  %v1123_v2 = vpop.f32.mrb[2].mxu1 }
 0x1de   :  { %v292_v3 = vadd.f32 %v1123_v2, %v197_v61  ;;  %v283_v4 = vpop.f32.mrb[3].mxu1  ;;  %v313_v6 = vmax.f32 %v289_v63, 0.0  ;;  %v1279_v2 = vld [vmem:[#allocation2 + $0xf0] sm:$0xff]  }
 0x1df   :  { %v284_v5 = vadd.f32 %v283_v4, %v197_v61  ;;  %v311_v8 = vmax.f32 %v281_v1, 0.0  ;;  %v1281_v4 = vld [vmem:[%s1529_s3] sm:$0xff]  }
 0x1e0   :  { %v314_v7 = vmax.f32 %v292_v3, 0.0  ;;  %v1280_v3 = vld [vmem:[#allocation2 + $0xf8] sm:$0xff]   ;;  %1224 = vmatprep.subr.bf16.mxu1 %v1281_v4 }
 0x1e1   :  { %v312_v9 = vmax.f32 %v284_v5, 0.0  ;;  %v1282_v5 = vld [vmem:[%s1529_s3 + $0x8] sm:$0xff]  }
 0x1e2   :  { %v320_v10 = vpack.c.bf16 %v314_v7, %v313_v6  ;;  %v1283_v6 = vld [vmem:[%s1529_s3 + $0x10] sm:$0xff]   ;;  %v488_v7 = vsub.s32 3, %v1462_v20 }
 0x1e3   :  { %v319_v11 = vpack.c.bf16 %v312_v9, %v311_v8  ;;  %v1126_v12 = vpop.f32.mrb[4].mxu1 }
 0x1e4   :  { %v305_v13 = vadd.f32 %v1126_v12, %v197_v61  ;;  %v296_v14 = vpop.f32.mrb[5].mxu1  ;;  %v489_v8 = vrot.slane %v1465_v22, %v488_v7 }
 0x1e5   :  { %v297_v15 = vadd.f32 %v296_v14, %v197_v61  ;;  %v1127_v16 = vpop.f32.mrb[6].mxu1  ;;  %1144 = vmatprep.mubr.bf16.mxu0 %v319_v11 }
 0x1e6   :  { %v308_v17 = vadd.f32 %v1127_v16, %v197_v61  ;;  %v299_v18 = vpop.f32.mrb[7].mxu1  ;;  %1145 = vmatmul.mubr.bf16.vlgmr.msra.gmra.mrb[8].mxu0 %v320_v10  ;;  %v317_v21 = vmax.f32 %v305_v13, 0.0 }
 0x1e7   :  { %v300_v19 = vadd.f32 %v299_v18, %v197_v61  ;;  %v315_v24 = vmax.f32 %v297_v15, 0.0  ;;  %1177 = vmatpush3.bf16.msra.mxu0 %v1273_v30 }
 0x1e8   :  { %v318_v23 = vmax.f32 %v308_v17, 0.0  ;;  %1178 = vmatprep.subr.bf16.mxu0 %v1274_v31 }
 0x1e9   :  { %v316_v25 = vmax.f32 %v300_v19, 0.0 }
 0x1ea   :  { %v322_v26 = vpack.c.bf16 %v318_v23, %v317_v21 }
 0x1eb   :  { %v321_v27 = vpack.c.bf16 %v316_v25, %v315_v24  ;;  %1179 = vmatpush3.bf16.msra.mxu0 %v1274_v31 }
 0x1ec   :  { %1180 = vmatprep.subr.bf16.mxu0 %v1275_v32 }
 0x1ed   :  { %1148 = vmatprep.mubr.bf16.mxu0 %v321_v27 }
 0x1ee   :  { %1149 = vmatmul.mubr.bf16.gmra.mrb[12].mxu0 %v322_v26 }
 0x1ef   :  { %1181 = vmatpush3.bf16.msra.mxu0 %v1275_v32 }
 0x1f0   :  { %1182 = vmatprep.subr.bf16.mxu0 %v1276_v33 }
 0x1f3   :  { %1183 = vmatpush3.bf16.msra.mxu0 %v1276_v33 }
 0x1f4   :  { %1184 = vmatprep.subr.bf16.mxu0 %v1277_v34 }
 0x1f7   :  { %1185 = vmatpush3.bf16.msra.mxu0 %v1277_v34 }
 0x1f8   :  { %1186 = vmatprep.subr.bf16.mxu0 %v1278_v35 }
 0x1fb   :  { %1187 = vmatpush3.bf16.msra.mxu0 %v1278_v35 }
 0x1fc   :  { %1188 = vmatprep.subr.bf16.mxu0 %v1279_v2 }
 0x1ff   :  { %1189 = vmatpush3.bf16.msra.mxu0 %v1279_v2 }
 0x200   :  { %1190 = vmatprep.subr.bf16.mxu0 %v1280_v3 }
 0x203   :  { %1191 = vmatpush3.bf16.msra.mxu0 %v1280_v3 }
 0x204   :  { %1200 = vmatprep.subr.bf16.mxu0 %v1281_v4 }
 0x2b9   :  { %v1146_v38 = vpop.f32.mrb[8].mxu0 }
 0x2ba   :  { %v435_v39 = vadd.f32 %v1146_v38, %v343_v37  ;;  %v426_v40 = vpop.f32.mrb[9].mxu0 }
 0x2bb   :  { %v427_v41 = vadd.f32 %v426_v40, %v343_v37  ;;  %v1147_v42 = vpop.f32.mrb[10].mxu0  ;;  %v1285_v40 = vld [vmem:[%s1529_s3 + $0x20] sm:$0xff]  }
 0x2bc   :  { %v438_v43 = vadd.f32 %v1147_v42, %v343_v37  ;;  %v429_v44 = vpop.f32.mrb[11].mxu0  ;;  %v459_v46 = vmax.f32 %v435_v39, 0.0  ;;  %v1284_v39 = vld [vmem:[%s1529_s3 + $0x18] sm:$0xff]   ;;  %v1287_v42 = vld [vmem:[%s1529_s3 + $0x30] sm:$0xff]  }
 0x2bd   :  { %v430_v45 = vadd.f32 %v429_v44, %v343_v37  ;;  %v457_v48 = vmax.f32 %v427_v41, 0.0  ;;  %v1286_v41 = vld [vmem:[%s1529_s3 + $0x28] sm:$0xff]   ;;  %v634_v44 = vsub.s32 4, %v1462_v20 }
 0x2be   :  { %v460_v47 = vmax.f32 %v438_v43, 0.0  ;;  %v1288_v43 = vld [vmem:[%s1529_s3 + $0x38] sm:$0xff]  }
 0x2bf   :  { %v458_v49 = vmax.f32 %v430_v45, 0.0  ;;  %v635_v45 = vrot.slane %v1465_v22, %v634_v44 }
 0x2c0   :  { %v466_v50 = vpack.c.bf16 %v460_v47, %v459_v46 }
 0x2c1   :  { %v465_v51 = vpack.c.bf16 %v458_v49, %v457_v48  ;;  %v1150_v52 = vpop.f32.mrb[12].mxu0 }
 0x2c2   :  { %v451_v53 = vadd.f32 %v1150_v52, %v343_v37  ;;  %v442_v54 = vpop.f32.mrb[13].mxu0 }
 0x2c3   :  { %v443_v55 = vadd.f32 %v442_v54, %v343_v37  ;;  %v1151_v56 = vpop.f32.mrb[14].mxu0  ;;  %1168 = vmatprep.mubr.bf16.mxu1 %v465_v51 }
 0x2c4   :  { %v454_v57 = vadd.f32 %v1151_v56, %v343_v37  ;;  %v445_v58 = vpop.f32.mrb[15].mxu0  ;;  %1169 = vmatmul.mubr.bf16.vlgmr.msra.gmra.mrb[8].mxu1 %v466_v50  ;;  %v463_v60 = vmax.f32 %v451_v53, 0.0 }
 0x2c5   :  { %v446_v59 = vadd.f32 %v445_v58, %v343_v37  ;;  %v461_v62 = vmax.f32 %v443_v55, 0.0  ;;  %1232 = vmatpush3.bf16.msra.mxu1 %v1281_v4 }
 0x2c6   :  { %v464_v61 = vmax.f32 %v454_v57, 0.0  ;;  %1225 = vmatprep.subr.bf16.mxu1 %v1282_v5 }
 0x2c7   :  { %v462_v63 = vmax.f32 %v446_v59, 0.0 }
 0x2c8   :  { %v468_v0 = vpack.c.bf16 %v464_v61, %v463_v60 }
 0x2c9   :  { %v467_v1 = vpack.c.bf16 %v462_v63, %v461_v62  ;;  %1233 = vmatpush3.bf16.msra.mxu1 %v1282_v5 }
 0x2ca   :  { %1226 = vmatprep.subr.bf16.mxu1 %v1283_v6 }
 0x2cb   :  { %1172 = vmatprep.mubr.bf16.mxu1 %v467_v1 }
 0x2cc   :  { %1173 = vmatmul.mubr.bf16.gmra.mrb[12].mxu1 %v468_v0 }
 0x2cd   :  { %1234 = vmatpush3.bf16.msra.mxu1 %v1283_v6 }
 0x2ce   :  { %1227 = vmatprep.subr.bf16.mxu1 %v1284_v39 }
 0x2d1   :  { %1235 = vmatpush3.bf16.msra.mxu1 %v1284_v39 }
 0x2d2   :  { %1228 = vmatprep.subr.bf16.mxu1 %v1285_v40 }
 0x2d5   :  { %1236 = vmatpush3.bf16.msra.mxu1 %v1285_v40 }
 0x2d6   :  { %1229 = vmatprep.subr.bf16.mxu1 %v1286_v41 }
 0x2d9   :  { %1237 = vmatpush3.bf16.msra.mxu1 %v1286_v41 }
 0x2da   :  { %1230 = vmatprep.subr.bf16.mxu1 %v1287_v42 }
 0x2dd   :  { %1238 = vmatpush3.bf16.msra.mxu1 %v1287_v42 }
 0x2de   :  { %1231 = vmatprep.subr.bf16.mxu1 %v1288_v43 }
 0x2e1   :  { %1239 = vmatpush3.bf16.msra.mxu1 %v1288_v43 }
 0x397   :  { %v1170_v9 = vpop.f32.mrb[8].mxu1 }
 0x398   :  { %v581_v10 = vadd.f32 %v1170_v9, %v489_v8  ;;  %v572_v11 = vpop.f32.mrb[9].mxu1 }
 0x399   :  { %v573_v12 = vadd.f32 %v572_v11, %v489_v8  ;;  %v1171_v13 = vpop.f32.mrb[10].mxu1 }
 0x39a   :  { %v584_v14 = vadd.f32 %v1171_v13, %v489_v8  ;;  %v575_v15 = vpop.f32.mrb[11].mxu1  ;;  %v605_v17 = vmax.f32 %v581_v10, 0.0  ;;  %v779_v10 = vsub.s32 5, %v1462_v20 }
 0x39b   :  { %v576_v16 = vadd.f32 %v575_v15, %v489_v8  ;;  %v603_v19 = vmax.f32 %v573_v12, 0.0 }
 0x39c   :  { %v606_v18 = vmax.f32 %v584_v14, 0.0  ;;  %v780_v11 = vrot.slane %v1465_v22, %v779_v10 }
 0x39d   :  { %v604_v21 = vmax.f32 %v576_v16, 0.0 }
 0x39e   :  { %v612_v23 = vpack.c.bf16 %v606_v18, %v605_v17 }
 0x39f   :  { %v611_v24 = vpack.c.bf16 %v604_v21, %v603_v19  ;;  %v1174_v25 = vpop.f32.mrb[12].mxu1 }
 0x3a0   :  { %v597_v26 = vadd.f32 %v1174_v25, %v489_v8  ;;  %v588_v27 = vpop.f32.mrb[13].mxu1 }
 0x3a1   :  { %v589_v28 = vadd.f32 %v588_v27, %v489_v8  ;;  %v1175_v29 = vpop.f32.mrb[14].mxu1  ;;  %1192 = vmatprep.mubr.bf16.mxu0 %v611_v24 }
 0x3a2   :  { %v600_v30 = vadd.f32 %v1175_v29, %v489_v8  ;;  %v591_v31 = vpop.f32.mrb[15].mxu1  ;;  %1193 = vmatmul.mubr.bf16.vlgmr.msra.gmra.mrb[16].mxu0 %v612_v23  ;;  %v609_v33 = vmax.f32 %v597_v26, 0.0 }
 0x3a3   :  { %v592_v32 = vadd.f32 %v591_v31, %v489_v8  ;;  %1201 = vmatpush3.bf16.msra.mxu0 %v1281_v4  ;;  %v607_v35 = vmax.f32 %v589_v28, 0.0 }
 0x3a4   :  { %v610_v34 = vmax.f32 %v600_v30, 0.0  ;;  %1202 = vmatprep.subr.bf16.mxu0 %v1282_v5 }
 0x3a5   :  { %v608_v36 = vmax.f32 %v592_v32, 0.0 }
 0x3a6   :  { %v614_v37 = vpack.c.bf16 %v610_v34, %v609_v33 }
 0x3a7   :  { %v613_v38 = vpack.c.bf16 %v608_v36, %v607_v35  ;;  %1203 = vmatpush3.bf16.msra.mxu0 %v1282_v5 }
 0x3a8   :  { %1204 = vmatprep.subr.bf16.mxu0 %v1283_v6 }
 0x3a9   :  { %1196 = vmatprep.mubr.bf16.mxu0 %v613_v38 }
 0x3aa   :  { %1197 = vmatmul.mubr.bf16.gmra.mrb[20].mxu0 %v614_v37 }
 0x3ab   :  { %1205 = vmatpush3.bf16.msra.mxu0 %v1283_v6 }
 0x3ac   :  { %1206 = vmatprep.subr.bf16.mxu0 %v1284_v39 }
 0x3af   :  { %1207 = vmatpush3.bf16.msra.mxu0 %v1284_v39 }
 0x3b0   :  { %1208 = vmatprep.subr.bf16.mxu0 %v1285_v40 }
 0x3b3   :  { %1209 = vmatpush3.bf16.msra.mxu0 %v1285_v40 }
 0x3b4   :  { %1210 = vmatprep.subr.bf16.mxu0 %v1286_v41 }
 0x3b7   :  { %1211 = vmatpush3.bf16.msra.mxu0 %v1286_v41 }
 0x3b8   :  { %1212 = vmatprep.subr.bf16.mxu0 %v1287_v42 }
 0x3bb   :  { %1213 = vmatpush3.bf16.msra.mxu0 %v1287_v42 }
 0x3bc   :  { %1214 = vmatprep.subr.bf16.mxu0 %v1288_v43 }
 0x3bf   :  { %1215 = vmatpush3.bf16.msra.mxu0 %v1288_v43 }
 0x475   :  { %v1194_v46 = vpop.f32.mrb[16].mxu0 }
 0x476   :  { %v727_v47 = vadd.f32 %v1194_v46, %v635_v45  ;;  %v718_v48 = vpop.f32.mrb[17].mxu0 }
 0x477   :  { %v719_v49 = vadd.f32 %v718_v48, %v635_v45  ;;  %v1195_v50 = vpop.f32.mrb[18].mxu0 }
 0x478   :  { %1289 = vtanh.f32 %v727_v47  ;;  %v730_v51 = vadd.f32 %v1195_v50, %v635_v45  ;;  %v721_v52 = vpop.f32.mrb[19].mxu0 }
 0x479   :  { %1291 = vtanh.f32 %v719_v49  ;;  %v722_v53 = vadd.f32 %v721_v52, %v635_v45 }
 0x47a   :  { %1293 = vtanh.f32 %v730_v51 }
 0x47b   :  { %1295 = vtanh.f32 %v722_v53 }
 0x47d   :  { %v1198_v54 = vpop.f32.mrb[20].mxu0 }
 0x47e   :  { %v743_v55 = vadd.f32 %v1198_v54, %v635_v45  ;;  %v734_v56 = vpop.f32.mrb[21].mxu0 }
 0x47f   :  { %v735_v57 = vadd.f32 %v734_v56, %v635_v45  ;;  %v1199_v58 = vpop.f32.mrb[22].mxu0 }
 0x480   :  { %1297 = vtanh.f32 %v743_v55  ;;  %v746_v59 = vadd.f32 %v1199_v58, %v635_v45  ;;  %v737_v60 = vpop.f32.mrb[23].mxu0 }
 0x481   :  { %1299 = vtanh.f32 %v735_v57  ;;  %v738_v61 = vadd.f32 %v737_v60, %v635_v45 }
 0x482   :  { %v1290_v62 = vpop.eup %1289  ;;  %1301 = vtanh.f32 %v746_v59 }
 0x483   :  { %v1292_v63 = vpop.eup %1291  ;;  %1303 = vtanh.f32 %v738_v61 }
 0x484   :  { %v1294_v0 = vpop.eup %1293 }
 0x485   :  { %v1296_v1 = vpop.eup %1295  ;;  %v758_v2 = vpack.c.bf16 %v1294_v0, %v1290_v62 }
 0x486   :  { %v757_v3 = vpack.c.bf16 %v1296_v1, %v1292_v63 }
 0x488   :  { %1216 = vmatprep.mubr.bf16.mxu0 %v757_v3 }
 0x489   :  { %1217 = vmatmul.mubr.bf16.vlgmr.msra.gmra.mrb[24].mxu0 %v758_v2 }
 0x48a   :  { %v1298_v4 = vpop.eup %1297 }
 0x48b   :  { %v1300_v5 = vpop.eup %1299 }
 0x48c   :  { %v1302_v6 = vpop.eup %1301 }
 0x48d   :  { %v1304_v7 = vpop.eup %1303  ;;  %v760_v8 = vpack.c.bf16 %v1302_v6, %v1298_v4 }
 0x48e   :  { %v759_v9 = vpack.c.bf16 %v1304_v7, %v1300_v5 }
 0x490   :  { %1220 = vmatprep.mubr.bf16.mxu1 %v759_v9 }
 0x491   :  { %1221 = vmatmul.mubr.bf16.vlgmr.msra.gmra.mrb[16].mxu1 %v760_v8 }
 0x55c   :  { %v1218_v12 = vpop.f32.mrb[24].mxu0 }
 0x55d   :  { %v872_v13 = vadd.f32 %v1218_v12, %v780_v11  ;;  %v863_v14 = vpop.f32.mrb[25].mxu0 }
 0x55e   :  { %v864_v15 = vadd.f32 %v863_v14, %v780_v11  ;;  %v1219_v16 = vpop.f32.mrb[26].mxu0 }
 0x55f   :  { %898 = vmax.xlane.f32.xlu1 %v872_v13  ;;  %v866_v17 = vpop.f32.mrb[27].mxu0  ;;  %v875_v18 = vadd.f32 %v1219_v16, %v780_v11 }
 0x560   :  { %894 = vmax.xlane.f32.xlu0 %v864_v15  ;;  %v867_v19 = vadd.f32 %v866_v17, %v780_v11 }
 0x563   :  { %900 = vmax.xlane.f32.xlu1 %v875_v18 }
 0x564   :  { %v1222_v21 = vpop.f32.mrb[16].mxu1  ;;  %896 = vmax.xlane.f32.xlu0 %v867_v19 }
 0x565   :  { %v879_v23 = vpop.f32.mrb[17].mxu1  ;;  %v888_v22 = vadd.f32 %v1222_v21, %v780_v11 }
 0x566   :  { %v880_v24 = vadd.f32 %v879_v23, %v780_v11  ;;  %v1223_v25 = vpop.f32.mrb[18].mxu1 }
 0x567   :  { %v882_v26 = vpop.f32.mrb[19].mxu1  ;;  %v891_v27 = vadd.f32 %v1223_v25, %v780_v11 }
 0x568   :  { %v883_v20 = vadd.f32 %v882_v26, %v780_v11  ;;  %902 = vmax.xlane.f32.xlu0 %v880_v24 }
 0x56a   :  { %904 = vmax.xlane.f32.xlu1 %v883_v20 }
 0x56c   :  { %906 = vmax.xlane.f32.xlu0 %v888_v22 }
 0x56e   :  { %908 = vmax.xlane.f32.xlu1 %v891_v27 }
 0x5ec   :  { %v899_v28 = vpop.xlane.xlu1 %898 }
 0x5ed   :  { %v912_v29 = vsub.f32 %v872_v13, %v899_v28  ;;  %v895_v30 = vpop.xlane.xlu0 %894 }
 0x5ee   :  { %v910_v31 = vsub.f32 %v864_v15, %v895_v30 }
 0x5ef   :  { %v922_v32 = vmul.f32 1.442695, %v912_v29 }
 0x5f0   :  { %v918_v33 = vmul.f32 1.442695, %v910_v31  ;;  %v901_v34 = vpop.xlane.xlu1 %900 }
 0x5f1   :  { %1305 = vpow2.f32 %v922_v32  ;;  %v913_v35 = vsub.f32 %v875_v18, %v901_v34  ;;  %v897_v36 = vpop.xlane.xlu0 %896 }
 0x5f2   :  { %v911_v37 = vsub.f32 %v867_v19, %v897_v36  ;;  %1307 = vpow2.f32 %v918_v33 }
 0x5f3   :  { %v924_v38 = vmul.f32 1.442695, %v913_v35 }
 0x5f4   :  { %v920_v39 = vmul.f32 1.442695, %v911_v37 }
 0x5f5   :  { %1309 = vpow2.f32 %v924_v38  ;;  %v903_v40 = vpop.xlane.xlu0 %902 }
 0x5f6   :  { %v914_v41 = vsub.f32 %v880_v24, %v903_v40  ;;  %1311 = vpow2.f32 %v920_v39 }
 0x5f7   :  { %v905_v42 = vpop.xlane.xlu1 %904 }
 0x5f8   :  { %v926_v43 = vmul.f32 1.442695, %v914_v41  ;;  %v915_v44 = vsub.f32 %v883_v20, %v905_v42 }
 0x5f9   :  { %v907_v45 = vpop.xlane.xlu0 %906 }
 0x5fa   :  { %1313 = vpow2.f32 %v926_v43  ;;  %v928_v46 = vmul.f32 1.442695, %v915_v44  ;;  %v916_v47 = vsub.f32 %v888_v22, %v907_v45 }
 0x5fb   :  { %v1306_v48 = vpop.eup %1305  ;;  %v909_v49 = vpop.xlane.xlu1 %908 }
 0x5fc   :  { %1315 = vpow2.f32 %v928_v46  ;;  %v930_v50 = vmul.f32 1.442695, %v916_v47  ;;  %v917_v51 = vsub.f32 %v891_v27, %v909_v49  ;;  %938 = vadd.xlane.f32.xlu0 %v1306_v48  ;;  %v1308_v52 = vpop.eup %1307 }
 0x5fe   :  { %1317 = vpow2.f32 %v930_v50  ;;  %v932_v53 = vmul.f32 1.442695, %v917_v51 }
 0x5ff   :  { %v1310_v54 = vpop.eup %1309 }
 0x600   :  { %1319 = vpow2.f32 %v932_v53  ;;  %940 = vadd.xlane.f32.xlu1 %v1310_v54  ;;  %934 = vadd.xlane.f32.xlu0 %v1308_v52  ;;  %v1312_v55 = vpop.eup %1311 }
 0x604   :  { %v1314_v56 = vpop.eup %1313  ;;  %936 = vadd.xlane.f32.xlu1 %v1312_v55 }
 0x605   :  { %942 = vadd.xlane.f32.xlu0 %v1314_v56 }
 0x606   :  { %v1316_v57 = vpop.eup %1315 }
 0x608   :  { %v1318_v58 = vpop.eup %1317  ;;  %944 = vadd.xlane.f32.xlu1 %v1316_v57 }
 0x609   :  { %946 = vadd.xlane.f32.xlu0 %v1318_v58 }
 0x60a   :  { %v1320_v59 = vpop.eup %1319 }
 0x60c   :  { %948 = vadd.xlane.f32.xlu1 %v1320_v59 }
 0x689   :  { %v939_v60 = vpop.xlane.xlu0 %938 }
 0x68a   :  { %1321 = vrcp.f32 %v939_v60 }
 0x68d   :  { %v941_v61 = vpop.xlane.xlu1 %940  ;;  %v935_v62 = vpop.xlane.xlu0 %934 }
 0x68e   :  { %1323 = vrcp.f32 %v941_v61 }
 0x68f   :  { %1325 = vrcp.f32 %v935_v62 }
 0x691   :  { %v937_v63 = vpop.xlane.xlu1 %936 }
 0x692   :  { %1327 = vrcp.f32 %v937_v63  ;;  %v943_v0 = vpop.xlane.xlu0 %942 }
 0x693   :  { %1329 = vrcp.f32 %v943_v0 }
 0x694   :  { %v1322_v1 = vpop.eup %1321 }
 0x695   :  { %v955_v2 = vmul.f32 %v1322_v1, %v1306_v48  ;;  %v945_v3 = vpop.xlane.xlu1 %944 }
 0x696   :  { %1331 = vrcp.f32 %v945_v3  ;;  %v947_v4 = vpop.xlane.xlu0 %946 }
 0x697   :  { %968 = vst [vmem:[%s1531_s5 + $0x10] sm:$0xff] %v955_v2  ;;  %1333 = vrcp.f32 %v947_v4 }
 0x698   :  { %v1324_v5 = vpop.eup %1323 }
 0x699   :  { %v1326_v6 = vpop.eup %1325  ;;  %v957_v7 = vmul.f32 %v1324_v5, %v1310_v54  ;;  %v949_v8 = vpop.xlane.xlu1 %948 }
 0x69a   :  { %v951_v9 = vmul.f32 %v1326_v6, %v1308_v52  ;;  %1335 = vrcp.f32 %v949_v8 }
 0x69b   :  { %969 = vst [vmem:[%s1531_s5 + $0x18] sm:$0xff] %v957_v7 }
 0x69c   :  { %v1328_v10 = vpop.eup %1327  ;;  %966 = vst [vmem:[%s1531_s5] sm:$0xff] %v951_v9 }
 0x69d   :  { %v1330_v11 = vpop.eup %1329  ;;  %v953_v12 = vmul.f32 %v1328_v10, %v1312_v55 }
 0x69e   :  { %v959_v13 = vmul.f32 %v1330_v11, %v1314_v56 }
 0x69f   :  { %967 = vst [vmem:[%s1531_s5 + $0x8] sm:$0xff] %v953_v12 }
 0x6a0   :  { %v1332_v14 = vpop.eup %1331  ;;  %970 = vst [vmem:[%s1531_s5 + $0x20] sm:$0xff] %v959_v13 }
 0x6a1   :  { %v1334_v15 = vpop.eup %1333  ;;  %v961_v16 = vmul.f32 %v1332_v14, %v1316_v57 }
 0x6a2   :  { %v963_v17 = vmul.f32 %v1334_v15, %v1318_v58 }
 0x6a3   :  { %971 = vst [vmem:[%s1531_s5 + $0x28] sm:$0xff] %v961_v16 }
 0x6a4   :  { %v1336_v18 = vpop.eup %1335  ;;  %972 = vst [vmem:[%s1531_s5 + $0x30] sm:$0xff] %v963_v17 }
 0x6a5   :  { %v965_v19 = vmul.f32 %v1336_v18, %v1320_v59 }
 0x6a7   :  { %973 = vst [vmem:[%s1531_s5 + $0x38] sm:$0xff] %v965_v19 }
 0x6a8   :  { %978 = vsyncpa [#allocation3], 1 }
 0x6a9   :  { %979 = vsyncpa [#allocation5], 1 }

</bundles_post_ra>
